<compile_context>
chip_gen: v7x
topology: tpu7x:2x2x1
jax: 0.10.0
libtpu: 0.0.40
codegen_flags: <defaults>
</compile_context>

<pallas_src>
import jax
import jax.numpy as jnp
import numpy as np
from jax import lax
from jax.experimental import pallas as pl
from jax.experimental.pallas import tpu as pltpu

NUM_CLASSES = 2
TOP_K = 5000
NMS_THRESH = 0.3
CONF_THRESH = 0.05
VAR0, VAR1 = 0.1, 0.2
NEG = -1.0e30
FOLD = 8  # candidates folded onto sublanes: each field is an (8, L) plane


# ---------------------------------------------------------------------------
# Fused decode + conf-threshold + greedy NMS kernel (one batch item per grid step)
# ---------------------------------------------------------------------------
def nms_kernel(loc_ref, pri_ref, sc_ref, boxes_ref, rank_ref, fld_ref, live_ref):
    # loc_ref  : VMEM (1, 4, 8, L)  loc preds [dx, dy, dw, dh], candidates folded (8, L)
    # pri_ref  : VMEM (1, 4, 8, L)  priors    [cx, cy, w, h]
    # sc_ref   : VMEM (1, 8, L)     class-1 confidence (NEG in padded slots)
    # boxes_ref: VMEM (1, 4, 8, L)  OUT decoded [x1, y1, x2, y2] (lane-dense)
    # rank_ref : VMEM (1, 8, L) i32 OUT greedy keep order per candidate, -1 = dropped
    # fld_ref  : VMEM (6, 8, L)     scratch: staged decode [x1, y1, x2, y2, area, id]
    # live_ref : VMEM (8, L)        scratch: remaining-candidate scores (NEG = dead)
    L = sc_ref.shape[-1]
    k_total = FOLD * L

    # ---- fused decode: prior + variance -> corner boxes (once per item) ----
    pw = pri_ref[0, 2]
    ph = pri_ref[0, 3]
    cx = pri_ref[0, 0] + loc_ref[0, 0] * VAR0 * pw
    cy = pri_ref[0, 1] + loc_ref[0, 1] * VAR0 * ph
    w = pw * jnp.exp(loc_ref[0, 2] * VAR1)
    h = ph * jnp.exp(loc_ref[0, 3] * VAR1)
    x1 = cx - 0.5 * w
    y1 = cy - 0.5 * h
    x2 = x1 + w
    y2 = y1 + h
    area = (x2 - x1) * (y2 - y1)

    # lane-dense decoded-box output (used by the wrapper-side scatter)
    boxes_ref[0, 0] = x1
    boxes_ref[0, 1] = y1
    boxes_ref[0, 2] = x2
    boxes_ref[0, 3] = y2

    # stage decode + flat candidate id once in VMEM; the loop re-reads slices instead
    # of carrying ~30 vregs of live values across the while_loop (avoids spill churn)
    row_i = lax.broadcasted_iota(jnp.int32, (FOLD, L), 0)
    col_i = lax.broadcasted_iota(jnp.int32, (FOLD, L), 1)
    fld_ref[0] = x1
    fld_ref[1] = y1
    fld_ref[2] = x2
    fld_ref[3] = y2
    fld_ref[4] = area
    fld_ref[5] = (row_i * L + col_i).astype(jnp.float32)  # flat candidate id

    sc = sc_ref[0]
    live_ref[...] = jnp.where(sc > CONF_THRESH, sc, NEG)
    rank_ref[0] = jnp.full((FOLD, L), -1, jnp.int32)

    # ---- greedy NMS with true early exit ----
    def cond(carry):
        _, alive = carry
        return alive > 0

    def body(carry):
        t, _ = carry
        live = live_ref[...]
        best = jnp.max(live)          # dense (8, L) reduction
        has = best > CONF_THRESH      # live entries are exactly those > CONF_THRESH

        @pl.when(has)
        def _():
            idx = fld_ref[5]
            # exactly-one-hot selection: lowest flat id on exact score ties.
            # TODO(synk): torch's stable sort breaks exact ties toward the highest
            # original prior index; generic float confidences never tie.
            bid = jnp.min(jnp.where(live == best, idx, jnp.float32(k_total)))
            onehot = idx == bid

            fx1 = fld_ref[0]
            fy1 = fld_ref[1]
            fx2 = fld_ref[2]
            fy2 = fld_ref[3]
            farea = fld_ref[4]

            # 4 independent masked extractions of the selected box (dense planes)
            sx1 = jnp.sum(jnp.where(onehot, fx1, 0.0))
            sy1 = jnp.sum(jnp.where(onehot, fy1, 0.0))
            sx2 = jnp.sum(jnp.where(onehot, fx2, 0.0))
            sy2 = jnp.sum(jnp.where(onehot, fy2, 0.0))
            sarea = (sx2 - sx1) * (sy2 - sy1)

            # record keep order; wrapper scatters [score, box] to output row t
            rank_ref[0] = jnp.where(onehot, t, rank_ref[0])

            # suppress the selected box and everything overlapping it.
            # multiply-compare IoU (inter > thresh * union): no divide, no NaN path.
            xx1 = jnp.maximum(fx1, sx1)
            yy1 = jnp.maximum(fy1, sy1)
            xx2 = jnp.minimum(fx2, sx2)
            yy2 = jnp.minimum(fy2, sy2)
            iw = jnp.maximum(xx2 - xx1, 0.0)
            ih = jnp.maximum(yy2 - yy1, 0.0)
            inter = iw * ih
            union = farea - inter + sarea
            kill = onehot | (inter > NMS_THRESH * union)
            live_ref[...] = jnp.where(kill, NEG, live)

        alive_next = jnp.logical_and(has, t + 1 < k_total).astype(jnp.int32)
        return t + 1, alive_next

    _ = lax.while_loop(cond, body, (jnp.int32(0), jnp.int32(1)))


def nms_pallas(loc_f, pri_f, sc_f):
    # loc_f/pri_f: (num, 4, 8, L) ; sc_f: (num, 8, L) ; L % 128 == 0
    num, _, fold, L = loc_f.shape
    grid_spec = pltpu.PrefetchScalarGridSpec(
        num_scalar_prefetch=0,
        grid=(num,),
        in_specs=[
            pl.BlockSpec((1, 4, fold, L), lambda b: (b, 0, 0, 0)),
            pl.BlockSpec((1, 4, fold, L), lambda b: (b, 0, 0, 0)),
            pl.BlockSpec((1, fold, L), lambda b: (b, 0, 0)),
        ],
        out_specs=[
            pl.BlockSpec((1, 4, fold, L), lambda b: (b, 0, 0, 0)),
            pl.BlockSpec((1, fold, L), lambda b: (b, 0, 0)),
        ],
        scratch_shapes=[
            pltpu.VMEM((6, fold, L), jnp.float32),
            pltpu.VMEM((fold, L), jnp.float32),
        ],
    )
    return pl.pallas_call(
        nms_kernel,
        out_shape=(
            jax.ShapeDtypeStruct((num, 4, fold, L), jnp.float32),
            jax.ShapeDtypeStruct((num, fold, L), jnp.int32),
        ),
        grid_spec=grid_spec,
        compiler_params=pltpu.CompilerParams(
            dimension_semantics=("parallel",)),  # batch items are independent
    )(loc_f, pri_f, sc_f)


# ---------------------------------------------------------------------------
# Detect.forward equivalent (light glue in plain JAX)
# ---------------------------------------------------------------------------
def detect_forward(loc_data, conf_data, prior_data):
    """
    loc_data  : (num, num_priors*4)
    conf_data : (num*num_priors, num_classes)
    prior_data: (num_priors, 4)  [cx, cy, w, h]
    returns   : (num, num_classes, TOP_K, 5)  rows = [score, x1, y1, x2, y2]
    """
    num = loc_data.shape[0]
    num_priors = prior_data.shape[0]
    k_cand = min(num_priors, TOP_K)
    k_pad = ((k_cand + 1023) // 1024) * 1024  # multiple of 8*128 for the (8, L) fold
    L = k_pad // FOLD

    scores_all = conf_data.reshape(num, num_priors, NUM_CLASSES)[:, :, 1]
    scores_all = scores_all.astype(jnp.float32)                         # (num, P)
    loc_b = loc_data.reshape(num, num_priors, 4).astype(jnp.float32)    # (num, P, 4)
    priors = prior_data.astype(jnp.float32)                             # (P, 4)

    # pre-reduce to the top min(P, TOP_K) class-1 scores (matches torch's idx[-top_k:])
    top_scores, top_idx = lax.top_k(scores_all, k_cand)                 # (num, k_cand)
    pad = k_pad - k_cand
    top_scores_p = jnp.pad(top_scores, ((0, 0), (0, pad)), constant_values=NEG)
    top_idx_p = jnp.pad(top_idx, ((0, 0), (0, pad)))                    # pad -> prior 0 (benign)

    loc_sel = jnp.take_along_axis(loc_b, top_idx_p[:, :, None], axis=1)  # (num, k_pad, 4)
    pri_sel = jnp.take(priors, top_idx_p, axis=0)                        # (num, k_pad, 4)

    loc_f = jnp.transpose(loc_sel, (0, 2, 1)).reshape(num, 4, FOLD, L)
    pri_f = jnp.transpose(pri_sel, (0, 2, 1)).reshape(num, 4, FOLD, L)
    sc_f = top_scores_p.reshape(num, FOLD, L)

    boxes_f, rank_f = nms_pallas(loc_f, pri_f, sc_f)

    # scatter kept detections into the final output by their greedy rank
    boxes_flat = boxes_f.reshape(num, 4, k_pad)                          # (num, 4, k_pad)
    det5 = jnp.concatenate([top_scores_p[:, None, :], boxes_flat], axis=1)
    det5 = jnp.transpose(det5, (0, 2, 1))                                # (num, k_pad, 5)
    rank_flat = rank_f.reshape(num, k_pad)
    rank_safe = jnp.where(rank_flat < 0, TOP_K, rank_flat)               # OOB sentinel -> dropped

    bidx = jnp.arange(num)[:, None]
    det_cls1 = jnp.zeros((num, TOP_K, 5), jnp.float32)
    det_cls1 = det_cls1.at[bidx, rank_safe, :].set(det5, mode="drop")

    output = jnp.zeros((num, NUM_CLASSES, TOP_K, 5), jnp.float32)
    output = output.at[:, 1].set(det_cls1)
    return output


if __name__ == "__main__":
    key = jax.random.PRNGKey(0)
    num, num_priors = 2, 128
    k1, k2, k3, k4 = jax.random.split(key, 4)

    loc_data = 0.5 * jax.random.normal(k1, (num, num_priors * 4), jnp.float32)
    conf_data = jax.random.uniform(k2, (num * num_priors, NUM_CLASSES), jnp.float32)
    cxcy = jax.random.uniform(k3, (num_priors, 2), jnp.float32)
    whp = jax.random.uniform(k4, (num_priors, 2), jnp.float32, minval=0.05, maxval=0.3)
    prior_data = jnp.concatenate([cxcy, whp], axis=1)

    out = jax.jit(detect_forward)(loc_data, conf_data, prior_data)
    out = jax.block_until_ready(out)
    assert out.shape == (num, NUM_CLASSES, TOP_K, 5)

    out_np = np.asarray(out)
    assert np.all(np.isfinite(out_np))

    # --- robust sanity checks against a float32 numpy reference ---
    loc_np = np.asarray(loc_data, np.float32)
    conf_np = np.asarray(conf_data, np.float32)
    pri_np = np.asarray(prior_data, np.float32)
    scores_np = conf_np.reshape(num, num_priors, NUM_CLASSES)[:, :, 1]

    for i in range(num):
        l = loc_np[i].reshape(-1, 4)
        cxy = pri_np[:, :2] + l[:, :2] * np.float32(VAR0) * pri_np[:, 2:]
        whd = pri_np[:, 2:] * np.exp(l[:, 2:] * np.float32(VAR1))
        boxes_ref = np.concatenate([cxy - whd / 2, cxy + whd / 2], axis=1)

        s = scores_np[i]
        dets = out_np[i, 1]                 # (TOP_K, 5)
        rows = dets[dets[:, 0] > 0.0]       # kept detections form a contiguous prefix
        assert rows.shape[0] >= 1

        # row 0 is the decoded best-scoring conf-passing candidate
        j = int(np.argmax(np.where(s > CONF_THRESH, s, -np.inf)))
        assert abs(float(rows[0, 0]) - float(s[j])) < 1e-6
        assert np.allclose(rows[0, 1:], boxes_ref[j], atol=1e-5)

        # scores are non-increasing down the detection list (greedy order)
        assert np.all(np.diff(rows[:, 0]) <= 1e-6)

        # every detection is (score, decoded box) of a conf-passing candidate
        for r in rows:
            cand = int(np.argmin(np.abs(s - r[0])))
            assert abs(float(s[cand]) - float(r[0])) < 1e-6
            assert s[cand] > CONF_THRESH
            assert np.allclose(r[1:], boxes_ref[cand], atol=1e-5)

        # kept boxes are mutually non-overlapping beyond the NMS threshold
        kb = rows[:, 1:]
        ka = (kb[:, 2] - kb[:, 0]) * (kb[:, 3] - kb[:, 1])
        for a in range(kb.shape[0]):
            for b in range(a + 1, kb.shape[0]):
                xx1 = max(kb[a, 0], kb[b, 0]); yy1 = max(kb[a, 1], kb[b, 1])
                xx2 = min(kb[a, 2], kb[b, 2]); yy2 = min(kb[a, 3], kb[b, 3])
                inter = max(xx2 - xx1, 0.0) * max(yy2 - yy1, 0.0)
                union = ka[a] + ka[b] - inter
                assert inter <= NMS_THRESH * union + 1e-4

    print("KERNEL_OK")
</pallas_src>

<mosaic_0001>
module attributes {stable_mosaic.version = 11 : i64} {
  func.func @nms_kernel(%arg0: i32, %arg1: memref<1x4x8x128xf32, #tpu.memory_space<vmem>>, %arg2: memref<1x4x8x128xf32, #tpu.memory_space<vmem>>, %arg3: memref<1x8x128xf32, #tpu.memory_space<vmem>>, %arg4: memref<1x4x8x128xf32, #tpu.memory_space<vmem>>, %arg5: memref<1x8x128xi32, #tpu.memory_space<vmem>>, %arg6: memref<6x8x128xf32, #tpu.memory_space<vmem>>, %arg7: memref<8x128xf32, #tpu.memory_space<vmem>>) attributes {dimension_semantics = [#tpu.dimension_semantics<parallel>], iteration_bounds = array<i64: 2>, scalar_prefetch = 0 : i64, scratch_operands = 2 : i64, tpu.core_type = #tpu.core_type<tc>, window_params = [{transform_indices = @transform_0, window_bounds = array<i64: 1, 4, 8, 128>}, {transform_indices = @transform_1, window_bounds = array<i64: 1, 4, 8, 128>}, {transform_indices = @transform_2, window_bounds = array<i64: 1, 8, 128>}, {transform_indices = @transform_3, window_bounds = array<i64: 1, 4, 8, 128>}, {transform_indices = @transform_4, window_bounds = array<i64: 1, 8, 128>}]} {
    %c0 = arith.constant 0 : index
    %c2 = arith.constant 2 : index
    %c0_0 = arith.constant 0 : index
    %c0_1 = arith.constant 0 : index
    %0 = vector.load %arg2[%c0, %c2, %c0_0, %c0_1] : memref<1x4x8x128xf32, #tpu.memory_space<vmem>>, vector<1x1x8x128xf32>
    %1 = vector.shape_cast %0 : vector<1x1x8x128xf32> to vector<8x128xf32>
    %c0_2 = arith.constant 0 : index
    %c3 = arith.constant 3 : index
    %c0_3 = arith.constant 0 : index
    %c0_4 = arith.constant 0 : index
    %2 = vector.load %arg2[%c0_2, %c3, %c0_3, %c0_4] : memref<1x4x8x128xf32, #tpu.memory_space<vmem>>, vector<1x1x8x128xf32>
    %3 = vector.shape_cast %2 : vector<1x1x8x128xf32> to vector<8x128xf32>
    %c0_5 = arith.constant 0 : index
    %c0_6 = arith.constant 0 : index
    %c0_7 = arith.constant 0 : index
    %c0_8 = arith.constant 0 : index
    %4 = vector.load %arg2[%c0_5, %c0_6, %c0_7, %c0_8] : memref<1x4x8x128xf32, #tpu.memory_space<vmem>>, vector<1x1x8x128xf32>
    %5 = vector.shape_cast %4 : vector<1x1x8x128xf32> to vector<8x128xf32>
    %c0_9 = arith.constant 0 : index
    %c0_10 = arith.constant 0 : index
    %c0_11 = arith.constant 0 : index
    %c0_12 = arith.constant 0 : index
    %6 = vector.load %arg1[%c0_9, %c0_10, %c0_11, %c0_12] : memref<1x4x8x128xf32, #tpu.memory_space<vmem>>, vector<1x1x8x128xf32>
    %7 = vector.shape_cast %6 : vector<1x1x8x128xf32> to vector<8x128xf32>
    %cst = arith.constant 1.000000e-01 : f32
    %8 = vector.broadcast %cst : f32 to vector<8x128xf32>
    %9 = arith.mulf %7, %8 : vector<8x128xf32>
    %10 = arith.mulf %9, %1 : vector<8x128xf32>
    %11 = arith.addf %5, %10 : vector<8x128xf32>
    %c0_13 = arith.constant 0 : index
    %c1 = arith.constant 1 : index
    %c0_14 = arith.constant 0 : index
    %c0_15 = arith.constant 0 : index
    %12 = vector.load %arg2[%c0_13, %c1, %c0_14, %c0_15] : memref<1x4x8x128xf32, #tpu.memory_space<vmem>>, vector<1x1x8x128xf32>
    %13 = vector.shape_cast %12 : vector<1x1x8x128xf32> to vector<8x128xf32>
    %c0_16 = arith.constant 0 : index
    %c1_17 = arith.constant 1 : index
    %c0_18 = arith.constant 0 : index
    %c0_19 = arith.constant 0 : index
    %14 = vector.load %arg1[%c0_16, %c1_17, %c0_18, %c0_19] : memref<1x4x8x128xf32, #tpu.memory_space<vmem>>, vector<1x1x8x128xf32>
    %15 = vector.shape_cast %14 : vector<1x1x8x128xf32> to vector<8x128xf32>
    %cst_20 = arith.constant 1.000000e-01 : f32
    %16 = vector.broadcast %cst_20 : f32 to vector<8x128xf32>
    %17 = arith.mulf %15, %16 : vector<8x128xf32>
    %18 = arith.mulf %17, %3 : vector<8x128xf32>
    %19 = arith.addf %13, %18 : vector<8x128xf32>
    %c0_21 = arith.constant 0 : index
    %c2_22 = arith.constant 2 : index
    %c0_23 = arith.constant 0 : index
    %c0_24 = arith.constant 0 : index
    %20 = vector.load %arg1[%c0_21, %c2_22, %c0_23, %c0_24] : memref<1x4x8x128xf32, #tpu.memory_space<vmem>>, vector<1x1x8x128xf32>
    %21 = vector.shape_cast %20 : vector<1x1x8x128xf32> to vector<8x128xf32>
    %cst_25 = arith.constant 2.000000e-01 : f32
    %22 = vector.broadcast %cst_25 : f32 to vector<8x128xf32>
    %23 = arith.mulf %21, %22 : vector<8x128xf32>
    %24 = math.exp %23 : vector<8x128xf32>
    %25 = arith.mulf %1, %24 : vector<8x128xf32>
    %c0_26 = arith.constant 0 : index
    %c3_27 = arith.constant 3 : index
    %c0_28 = arith.constant 0 : index
    %c0_29 = arith.constant 0 : index
    %26 = vector.load %arg1[%c0_26, %c3_27, %c0_28, %c0_29] : memref<1x4x8x128xf32, #tpu.memory_space<vmem>>, vector<1x1x8x128xf32>
    %27 = vector.shape_cast %26 : vector<1x1x8x128xf32> to vector<8x128xf32>
    %cst_30 = arith.constant 2.000000e-01 : f32
    %28 = vector.broadcast %cst_30 : f32 to vector<8x128xf32>
    %29 = arith.mulf %27, %28 : vector<8x128xf32>
    %30 = math.exp %29 : vector<8x128xf32>
    %31 = arith.mulf %3, %30 : vector<8x128xf32>
    %cst_31 = arith.constant 5.000000e-01 : f32
    %32 = vector.broadcast %cst_31 : f32 to vector<8x128xf32>
    %33 = arith.mulf %32, %25 : vector<8x128xf32>
    %34 = arith.subf %11, %33 : vector<8x128xf32>
    %cst_32 = arith.constant 5.000000e-01 : f32
    %35 = vector.broadcast %cst_32 : f32 to vector<8x128xf32>
    %36 = arith.mulf %35, %31 : vector<8x128xf32>
    %37 = arith.subf %19, %36 : vector<8x128xf32>
    %38 = arith.addf %34, %25 : vector<8x128xf32>
    %39 = arith.addf %37, %31 : vector<8x128xf32>
    %40 = arith.subf %38, %34 : vector<8x128xf32>
    %41 = arith.subf %39, %37 : vector<8x128xf32>
    %42 = arith.mulf %40, %41 : vector<8x128xf32>
    %c0_33 = arith.constant 0 : index
    %c0_34 = arith.constant 0 : index
    %c0_35 = arith.constant 0 : index
    %c0_36 = arith.constant 0 : index
    %43 = vector.load %arg4[%c0_33, %c0_34, %c0_35, %c0_36] : memref<1x4x8x128xf32, #tpu.memory_space<vmem>>, vector<1x1x8x128xf32>
    %44 = vector.shape_cast %43 : vector<1x1x8x128xf32> to vector<8x128xf32>
    %45 = vector.shape_cast %34 : vector<8x128xf32> to vector<1x1x8x128xf32>
    tpu.vector_store %arg4[%c0_33, %c0_34, %c0_35, %c0_36], %45 {strides = array<i32>} : memref<1x4x8x128xf32, #tpu.memory_space<vmem>>, vector<1x1x8x128xf32>,
    %c0_37 = arith.constant 0 : index
    %c1_38 = arith.constant 1 : index
    %c0_39 = arith.constant 0 : index
    %c0_40 = arith.constant 0 : index
    %46 = vector.load %arg4[%c0_37, %c1_38, %c0_39, %c0_40] : memref<1x4x8x128xf32, #tpu.memory_space<vmem>>, vector<1x1x8x128xf32>
    %47 = vector.shape_cast %46 : vector<1x1x8x128xf32> to vector<8x128xf32>
    %48 = vector.shape_cast %37 : vector<8x128xf32> to vector<1x1x8x128xf32>
    tpu.vector_store %arg4[%c0_37, %c1_38, %c0_39, %c0_40], %48 {strides = array<i32>} : memref<1x4x8x128xf32, #tpu.memory_space<vmem>>, vector<1x1x8x128xf32>,
    %c0_41 = arith.constant 0 : index
    %c2_42 = arith.constant 2 : index
    %c0_43 = arith.constant 0 : index
    %c0_44 = arith.constant 0 : index
    %49 = vector.load %arg4[%c0_41, %c2_42, %c0_43, %c0_44] : memref<1x4x8x128xf32, #tpu.memory_space<vmem>>, vector<1x1x8x128xf32>
    %50 = vector.shape_cast %49 : vector<1x1x8x128xf32> to vector<8x128xf32>
    %51 = vector.shape_cast %38 : vector<8x128xf32> to vector<1x1x8x128xf32>
    tpu.vector_store %arg4[%c0_41, %c2_42, %c0_43, %c0_44], %51 {strides = array<i32>} : memref<1x4x8x128xf32, #tpu.memory_space<vmem>>, vector<1x1x8x128xf32>,
    %c0_45 = arith.constant 0 : index
    %c3_46 = arith.constant 3 : index
    %c0_47 = arith.constant 0 : index
    %c0_48 = arith.constant 0 : index
    %52 = vector.load %arg4[%c0_45, %c3_46, %c0_47, %c0_48] : memref<1x4x8x128xf32, #tpu.memory_space<vmem>>, vector<1x1x8x128xf32>
    %53 = vector.shape_cast %52 : vector<1x1x8x128xf32> to vector<8x128xf32>
    %54 = vector.shape_cast %39 : vector<8x128xf32> to vector<1x1x8x128xf32>
    tpu.vector_store %arg4[%c0_45, %c3_46, %c0_47, %c0_48], %54 {strides = array<i32>} : memref<1x4x8x128xf32, #tpu.memory_space<vmem>>, vector<1x1x8x128xf32>,
    %55 = tpu.iota {dimensions = array<i32: 0>} : vector<8x128xi32>
    %56 = tpu.iota {dimensions = array<i32: 1>} : vector<8x128xi32>
    %c0_49 = arith.constant 0 : index
    %c0_50 = arith.constant 0 : index
    %c0_51 = arith.constant 0 : index
    %57 = vector.load %arg6[%c0_49, %c0_50, %c0_51] : memref<6x8x128xf32, #tpu.memory_space<vmem>>, vector<1x8x128xf32>
    %58 = vector.shape_cast %57 : vector<1x8x128xf32> to vector<8x128xf32>
    %59 = vector.shape_cast %34 : vector<8x128xf32> to vector<1x8x128xf32>
    tpu.vector_store %arg6[%c0_49, %c0_50, %c0_51], %59 {strides = array<i32>} : memref<6x8x128xf32, #tpu.memory_space<vmem>>, vector<1x8x128xf32>,
    %c1_52 = arith.constant 1 : index
    %c0_53 = arith.constant 0 : index
    %c0_54 = arith.constant 0 : index
    %60 = vector.load %arg6[%c1_52, %c0_53, %c0_54] : memref<6x8x128xf32, #tpu.memory_space<vmem>>, vector<1x8x128xf32>
    %61 = vector.shape_cast %60 : vector<1x8x128xf32> to vector<8x128xf32>
    %62 = vector.shape_cast %37 : vector<8x128xf32> to vector<1x8x128xf32>
    tpu.vector_store %arg6[%c1_52, %c0_53, %c0_54], %62 {strides = array<i32>} : memref<6x8x128xf32, #tpu.memory_space<vmem>>, vector<1x8x128xf32>,
    %c2_55 = arith.constant 2 : index
    %c0_56 = arith.constant 0 : index
    %c0_57 = arith.constant 0 : index
    %63 = vector.load %arg6[%c2_55, %c0_56, %c0_57] : memref<6x8x128xf32, #tpu.memory_space<vmem>>, vector<1x8x128xf32>
    %64 = vector.shape_cast %63 : vector<1x8x128xf32> to vector<8x128xf32>
    %65 = vector.shape_cast %38 : vector<8x128xf32> to vector<1x8x128xf32>
    tpu.vector_store %arg6[%c2_55, %c0_56, %c0_57], %65 {strides = array<i32>} : memref<6x8x128xf32, #tpu.memory_space<vmem>>, vector<1x8x128xf32>,
    %c3_58 = arith.constant 3 : index
    %c0_59 = arith.constant 0 : index
    %c0_60 = arith.constant 0 : index
    %66 = vector.load %arg6[%c3_58, %c0_59, %c0_60] : memref<6x8x128xf32, #tpu.memory_space<vmem>>, vector<1x8x128xf32>
    %67 = vector.shape_cast %66 : vector<1x8x128xf32> to vector<8x128xf32>
    %68 = vector.shape_cast %39 : vector<8x128xf32> to vector<1x8x128xf32>
    tpu.vector_store %arg6[%c3_58, %c0_59, %c0_60], %68 {strides = array<i32>} : memref<6x8x128xf32, #tpu.memory_space<vmem>>, vector<1x8x128xf32>,
    %c4 = arith.constant 4 : index
    %c0_61 = arith.constant 0 : index
    %c0_62 = arith.constant 0 : index
    %69 = vector.load %arg6[%c4, %c0_61, %c0_62] : memref<6x8x128xf32, #tpu.memory_space<vmem>>, vector<1x8x128xf32>
    %70 = vector.shape_cast %69 : vector<1x8x128xf32> to vector<8x128xf32>
    %71 = vector.shape_cast %42 : vector<8x128xf32> to vector<1x8x128xf32>
    tpu.vector_store %arg6[%c4, %c0_61, %c0_62], %71 {strides = array<i32>} : memref<6x8x128xf32, #tpu.memory_space<vmem>>, vector<1x8x128xf32>,
    %c128_i32 = arith.constant 128 : i32
    %72 = vector.broadcast %c128_i32 : i32 to vector<8x128xi32>
    %73 = arith.muli %55, %72 : vector<8x128xi32>
    %74 = arith.addi %73, %56 : vector<8x128xi32>
    %75 = arith.sitofp %74 : vector<8x128xi32> to vector<8x128xf32>
    %c5 = arith.constant 5 : index
    %c0_63 = arith.constant 0 : index
    %c0_64 = arith.constant 0 : index
    %76 = vector.load %arg6[%c5, %c0_63, %c0_64] : memref<6x8x128xf32, #tpu.memory_space<vmem>>, vector<1x8x128xf32>
    %77 = vector.shape_cast %76 : vector<1x8x128xf32> to vector<8x128xf32>
    %78 = vector.shape_cast %75 : vector<8x128xf32> to vector<1x8x128xf32>
    tpu.vector_store %arg6[%c5, %c0_63, %c0_64], %78 {strides = array<i32>} : memref<6x8x128xf32, #tpu.memory_space<vmem>>, vector<1x8x128xf32>,
    %c0_65 = arith.constant 0 : index
    %c0_66 = arith.constant 0 : index
    %c0_67 = arith.constant 0 : index
    %79 = vector.load %arg3[%c0_65, %c0_66, %c0_67] : memref<1x8x128xf32, #tpu.memory_space<vmem>>, vector<1x8x128xf32>
    %80 = vector.shape_cast %79 : vector<1x8x128xf32> to vector<8x128xf32>
    %cst_68 = arith.constant 5.000000e-02 : f32
    %81 = vector.broadcast %cst_68 : f32 to vector<8x128xf32>
    %82 = arith.cmpf ogt, %80, %81 : vector<8x128xf32>
    %cst_69 = arith.constant -1.000000e+30 : f32
    %83 = vector.broadcast %cst_69 : f32 to vector<8x128xf32>
    %84 = arith.select %82, %80, %83 : vector<8x128xi1>, vector<8x128xf32>
    %c0_70 = arith.constant 0 : index
    %c0_71 = arith.constant 0 : index
    %85 = vector.load %arg7[%c0_70, %c0_71] : memref<8x128xf32, #tpu.memory_space<vmem>>, vector<8x128xf32>
    tpu.vector_store %arg7[%c0_70, %c0_71], %84 {strides = array<i32>} : memref<8x128xf32, #tpu.memory_space<vmem>>, vector<8x128xf32>,
    %c-1_i32 = arith.constant -1 : i32
    %86 = vector.broadcast %c-1_i32 : i32 to vector<8x128xi32>
    %c0_72 = arith.constant 0 : index
    %c0_73 = arith.constant 0 : index
    %c0_74 = arith.constant 0 : index
    %87 = vector.load %arg5[%c0_72, %c0_73, %c0_74] : memref<1x8x128xi32, #tpu.memory_space<vmem>>, vector<1x8x128xi32>
    %88 = vector.shape_cast %87 : vector<1x8x128xi32> to vector<8x128xi32>
    %89 = vector.shape_cast %86 : vector<8x128xi32> to vector<1x8x128xi32>
    tpu.vector_store %arg5[%c0_72, %c0_73, %c0_74], %89 {strides = array<i32>} : memref<1x8x128xi32, #tpu.memory_space<vmem>>, vector<1x8x128xi32>,
    %c0_i32 = arith.constant 0 : i32
    %c1_i32 = arith.constant 1 : i32
    %90:2 = scf.while (%arg8 = %c0_i32, %arg9 = %c1_i32) : (i32, i32) -> (i32, i32) {
      %c0_i32_75 = arith.constant 0 : i32
      %91 = arith.cmpi sgt, %arg9, %c0_i32_75 : i32
      scf.condition(%91) %arg8, %arg9 : i32, i32
    } do {
    ^bb0(%arg8: i32, %arg9: i32):
      %c0_75 = arith.constant 0 : index
      %c0_76 = arith.constant 0 : index
      %91 = vector.load %arg7[%c0_75, %c0_76] : memref<8x128xf32, #tpu.memory_space<vmem>>, vector<8x128xf32>
      %92 = vector.shape_cast %91 : vector<8x128xf32> to vector<1x8x128xf32>
      %cst_77 = arith.constant dense<0xFF800000> : vector<1xf32>
      %93 = vector.multi_reduction <maximumf>, %92, %cst_77 [1, 2] : vector<1x8x128xf32> to vector<1xf32>
      %94 = vector.shape_cast %93 : vector<1xf32> to vector<1x1x1xf32>
      %95 = vector.extract %94[0, 0, 0] : f32 from vector<1x1x1xf32>
      %cst_78 = arith.constant 5.000000e-02 : f32
      %96 = arith.cmpf ogt, %95, %cst_78 : f32
      %97 = arith.extui %96 : i1 to i32
      %c0_i32_79 = arith.constant 0 : i32
      %98 = arith.cmpi ne, %97, %c0_i32_79 : i32
      scf.if %98 {
        %c5_82 = arith.constant 5 : index
        %c0_83 = arith.constant 0 : index
        %c0_84 = arith.constant 0 : index
        %104 = vector.load %arg6[%c5_82, %c0_83, %c0_84] : memref<6x8x128xf32, #tpu.memory_space<vmem>>, vector<1x8x128xf32>
        %105 = vector.shape_cast %104 : vector<1x8x128xf32> to vector<8x128xf32>
        %106 = vector.broadcast %95 : f32 to vector<8x128xf32>
        %107 = arith.cmpf oeq, %91, %106 : vector<8x128xf32>
        %cst_85 = arith.constant 1.024000e+03 : f32
        %108 = vector.broadcast %cst_85 : f32 to vector<8x128xf32>
        %109 = arith.select %107, %105, %108 : vector<8x128xi1>, vector<8x128xf32>
        %110 = vector.shape_cast %109 : vector<8x128xf32> to vector<1x8x128xf32>
        %cst_86 = arith.constant dense<0x7F800000> : vector<1xf32>
        %111 = vector.multi_reduction <minimumf>, %110, %cst_86 [1, 2] : vector<1x8x128xf32> to vector<1xf32>
        %112 = vector.shape_cast %111 : vector<1xf32> to vector<1x1x1xf32>
        %113 = vector.extract %112[0, 0, 0] : f32 from vector<1x1x1xf32>
        %114 = vector.broadcast %113 : f32 to vector<8x128xf32>
        %115 = arith.cmpf oeq, %105, %114 : vector<8x128xf32>
        %c0_87 = arith.constant 0 : index
        %c0_88 = arith.constant 0 : index
        %c0_89 = arith.constant 0 : index
        %116 = vector.load %arg6[%c0_87, %c0_88, %c0_89] : memref<6x8x128xf32, #tpu.memory_space<vmem>>, vector<1x8x128xf32>
        %117 = vector.shape_cast %116 : vector<1x8x128xf32> to vector<8x128xf32>
        %c1_90 = arith.constant 1 : index
        %c0_91 = arith.constant 0 : index
        %c0_92 = arith.constant 0 : index
        %118 = vector.load %arg6[%c1_90, %c0_91, %c0_92] : memref<6x8x128xf32, #tpu.memory_space<vmem>>, vector<1x8x128xf32>
        %119 = vector.shape_cast %118 : vector<1x8x128xf32> to vector<8x128xf32>
        %c2_93 = arith.constant 2 : index
        %c0_94 = arith.constant 0 : index
        %c0_95 = arith.constant 0 : index
        %120 = vector.load %arg6[%c2_93, %c0_94, %c0_95] : memref<6x8x128xf32, #tpu.memory_space<vmem>>, vector<1x8x128xf32>
        %121 = vector.shape_cast %120 : vector<1x8x128xf32> to vector<8x128xf32>
        %c3_96 = arith.constant 3 : index
        %c0_97 = arith.constant 0 : index
        %c0_98 = arith.constant 0 : index
        %122 = vector.load %arg6[%c3_96, %c0_97, %c0_98] : memref<6x8x128xf32, #tpu.memory_space<vmem>>, vector<1x8x128xf32>
        %123 = vector.shape_cast %122 : vector<1x8x128xf32> to vector<8x128xf32>
        %c4_99 = arith.constant 4 : index
        %c0_100 = arith.constant 0 : index
        %c0_101 = arith.constant 0 : index
        %124 = vector.load %arg6[%c4_99, %c0_100, %c0_101] : memref<6x8x128xf32, #tpu.memory_space<vmem>>, vector<1x8x128xf32>
        %125 = vector.shape_cast %124 : vector<1x8x128xf32> to vector<8x128xf32>
        %cst_102 = arith.constant 0.000000e+00 : f32
        %126 = vector.broadcast %cst_102 : f32 to vector<8x128xf32>
        %127 = arith.select %115, %117, %126 : vector<8x128xi1>, vector<8x128xf32>
        %128 = vector.shape_cast %127 : vector<8x128xf32> to vector<1x8x128xf32>
        %cst_103 = arith.constant dense<0.000000e+00> : vector<1xf32>
        %129 = vector.multi_reduction <add>, %128, %cst_103 [1, 2] : vector<1x8x128xf32> to vector<1xf32>
        %130 = vector.shape_cast %129 : vector<1xf32> to vector<1x1x1xf32>
        %131 = vector.extract %130[0, 0, 0] : f32 from vector<1x1x1xf32>
        %cst_104 = arith.constant 0.000000e+00 : f32
        %132 = vector.broadcast %cst_104 : f32 to vector<8x128xf32>
        %133 = arith.select %115, %119, %132 : vector<8x128xi1>, vector<8x128xf32>
        %134 = vector.shape_cast %133 : vector<8x128xf32> to vector<1x8x128xf32>
        %cst_105 = arith.constant dense<0.000000e+00> : vector<1xf32>
        %135 = vector.multi_reduction <add>, %134, %cst_105 [1, 2] : vector<1x8x128xf32> to vector<1xf32>
        %136 = vector.shape_cast %135 : vector<1xf32> to vector<1x1x1xf32>
        %137 = vector.extract %136[0, 0, 0] : f32 from vector<1x1x1xf32>
        %cst_106 = arith.constant 0.000000e+00 : f32
        %138 = vector.broadcast %cst_106 : f32 to vector<8x128xf32>
        %139 = arith.select %115, %121, %138 : vector<8x128xi1>, vector<8x128xf32>
        %140 = vector.shape_cast %139 : vector<8x128xf32> to vector<1x8x128xf32>
        %cst_107 = arith.constant dense<0.000000e+00> : vector<1xf32>
        %141 = vector.multi_reduction <add>, %140, %cst_107 [1, 2] : vector<1x8x128xf32> to vector<1xf32>
        %142 = vector.shape_cast %141 : vector<1xf32> to vector<1x1x1xf32>
        %143 = vector.extract %142[0, 0, 0] : f32 from vector<1x1x1xf32>
        %cst_108 = arith.constant 0.000000e+00 : f32
        %144 = vector.broadcast %cst_108 : f32 to vector<8x128xf32>
        %145 = arith.select %115, %123, %144 : vector<8x128xi1>, vector<8x128xf32>
        %146 = vector.shape_cast %145 : vector<8x128xf32> to vector<1x8x128xf32>
        %cst_109 = arith.constant dense<0.000000e+00> : vector<1xf32>
        %147 = vector.multi_reduction <add>, %146, %cst_109 [1, 2] : vector<1x8x128xf32> to vector<1xf32>
        %148 = vector.shape_cast %147 : vector<1xf32> to vector<1x1x1xf32>
        %149 = vector.extract %148[0, 0, 0] : f32 from vector<1x1x1xf32>
        %150 = arith.subf %143, %131 : f32
        %151 = arith.subf %149, %137 : f32
        %152 = arith.mulf %150, %151 : f32
        %c0_110 = arith.constant 0 : index
        %c0_111 = arith.constant 0 : index
        %c0_112 = arith.constant 0 : index
        %153 = vector.load %arg5[%c0_110, %c0_111, %c0_112] : memref<1x8x128xi32, #tpu.memory_space<vmem>>, vector<1x8x128xi32>
        %154 = vector.shape_cast %153 : vector<1x8x128xi32> to vector<8x128xi32>
        %155 = vector.broadcast %arg8 : i32 to vector<8x128xi32>
        %156 = arith.select %115, %155, %154 : vector<8x128xi1>, vector<8x128xi32>
        %c0_113 = arith.constant 0 : index
        %c0_114 = arith.constant 0 : index
        %c0_115 = arith.constant 0 : index
        %157 = vector.load %arg5[%c0_113, %c0_114, %c0_115] : memref<1x8x128xi32, #tpu.memory_space<vmem>>, vector<1x8x128xi32>
        %158 = vector.shape_cast %157 : vector<1x8x128xi32> to vector<8x128xi32>
        %159 = vector.shape_cast %156 : vector<8x128xi32> to vector<1x8x128xi32>
        tpu.vector_store %arg5[%c0_113, %c0_114, %c0_115], %159 {strides = array<i32>} : memref<1x8x128xi32, #tpu.memory_space<vmem>>, vector<1x8x128xi32>,
        %160 = vector.broadcast %131 : f32 to vector<8x128xf32>
        %161 = arith.maximumf %117, %160 : vector<8x128xf32>
        %162 = vector.broadcast %137 : f32 to vector<8x128xf32>
        %163 = arith.maximumf %119, %162 : vector<8x128xf32>
        %164 = vector.broadcast %143 : f32 to vector<8x128xf32>
        %165 = arith.minimumf %121, %164 : vector<8x128xf32>
        %166 = vector.broadcast %149 : f32 to vector<8x128xf32>
        %167 = arith.minimumf %123, %166 : vector<8x128xf32>
        %168 = arith.subf %165, %161 : vector<8x128xf32>
        %cst_116 = arith.constant 0.000000e+00 : f32
        %169 = vector.broadcast %cst_116 : f32 to vector<8x128xf32>
        %170 = arith.maximumf %168, %169 : vector<8x128xf32>
        %171 = arith.subf %167, %163 : vector<8x128xf32>
        %cst_117 = arith.constant 0.000000e+00 : f32
        %172 = vector.broadcast %cst_117 : f32 to vector<8x128xf32>
        %173 = arith.maximumf %171, %172 : vector<8x128xf32>
        %174 = arith.mulf %170, %173 : vector<8x128xf32>
        %175 = arith.subf %125, %174 : vector<8x128xf32>
        %176 = vector.broadcast %152 : f32 to vector<8x128xf32>
        %177 = arith.addf %175, %176 : vector<8x128xf32>
        %cst_118 = arith.constant 3.000000e-01 : f32
        %178 = vector.broadcast %cst_118 : f32 to vector<8x128xf32>
        %179 = arith.mulf %178, %177 : vector<8x128xf32>
        %180 = arith.cmpf ogt, %174, %179 : vector<8x128xf32>
        %181 = arith.ori %115, %180 : vector<8x128xi1>
        %cst_119 = arith.constant -1.000000e+30 : f32
        %182 = vector.broadcast %cst_119 : f32 to vector<8x128xf32>
        %183 = arith.select %181, %182, %91 : vector<8x128xi1>, vector<8x128xf32>
        %c0_120 = arith.constant 0 : index
        %c0_121 = arith.constant 0 : index
        %184 = vector.load %arg7[%c0_120, %c0_121] : memref<8x128xf32, #tpu.memory_space<vmem>>, vector<8x128xf32>
        tpu.vector_store %arg7[%c0_120, %c0_121], %183 {strides = array<i32>} : memref<8x128xf32, #tpu.memory_space<vmem>>, vector<8x128xf32>,
      } else {
      }
      %c1_i32_80 = arith.constant 1 : i32
      %99 = arith.addi %arg8, %c1_i32_80 : i32
      %c1024_i32 = arith.constant 1024 : i32
      %100 = arith.cmpi slt, %99, %c1024_i32 : i32
      %101 = arith.andi %96, %100 : i1
      %102 = arith.extui %101 : i1 to i32
      %c1_i32_81 = arith.constant 1 : i32
      %103 = arith.addi %arg8, %c1_i32_81 : i32
      scf.yield %103, %102 : i32, i32
    }
    return
  }
  func.func @transform_0(%arg0: i32) -> (i32, i32, i32, i32) {
    %c0_i32 = arith.constant 0 : i32
    %c0_i32_0 = arith.constant 0 : i32
    %c0_i32_1 = arith.constant 0 : i32
    %c0_i32_2 = arith.constant 0 : i32
    return %arg0, %c0_i32, %c0_i32_0, %c0_i32_1 : i32, i32, i32, i32
  }
  func.func @transform_1(%arg0: i32) -> (i32, i32, i32, i32) {
    %c0_i32 = arith.constant 0 : i32
    %c0_i32_0 = arith.constant 0 : i32
    %c0_i32_1 = arith.constant 0 : i32
    %c0_i32_2 = arith.constant 0 : i32
    return %arg0, %c0_i32, %c0_i32_0, %c0_i32_1 : i32, i32, i32, i32
  }
  func.func @transform_2(%arg0: i32) -> (i32, i32, i32) {
    %c0_i32 = arith.constant 0 : i32
    %c0_i32_0 = arith.constant 0 : i32
    %c0_i32_1 = arith.constant 0 : i32
    return %arg0, %c0_i32, %c0_i32_0 : i32, i32, i32
  }
  func.func @transform_3(%arg0: i32) -> (i32, i32, i32, i32) {
    %c0_i32 = arith.constant 0 : i32
    %c0_i32_0 = arith.constant 0 : i32
    %c0_i32_1 = arith.constant 0 : i32
    %c0_i32_2 = arith.constant 0 : i32
    return %arg0, %c0_i32, %c0_i32_0, %c0_i32_1 : i32, i32, i32, i32
  }
  func.func @transform_4(%arg0: i32) -> (i32, i32, i32) {
    %c0_i32 = arith.constant 0 : i32
    %c0_i32_0 = arith.constant 0 : i32
    %c0_i32_1 = arith.constant 0 : i32
    return %arg0, %c0_i32, %c0_i32_0 : i32, i32, i32
  }
}

</mosaic_0001>

<bundles_post_ra>
// kernel: detect_forward.1
= control target key start
LH: loop header
LB: loop body
LE: loop exit
PB: predicated region body
PF: predicated region fallthrough
CT: control target
= control target key end

     0   :  { %s647_s15 = smov 0   ;;  %s721_s0 = inlined_call_operand.vmem [shape: f32[2,4,8,128], index: 0, kind: input, shape index: {}]   ;;  %s722_s1 = inlined_call_operand.vmem [shape: f32[2,4,8,128], index: 1, kind: input, shape index: {}]   ;;  %s723_s2 = inlined_call_operand.vmem [shape: f32[2,8,128], index: 2, kind: input, shape index: {}]   ;;  %s724_s3 = inlined_call_operand.vmem [shape: f32[2,4,8,128], index: 3, kind: output, shape index: {0}]   ;;  %s725_s4 = inlined_call_operand.vmem [shape: s32[2,8,128], index: 4, kind: output, shape index: {1}]  }
   0x1 LB: > { %s544_s16 = sadd.s32 4294967295, %s615_s15   ;;  %p548_p0 = scmp.ge.s32.totalorder %s615_s15, 1  ;;  %s615_s15 = sphi %s647_s15, %s15_s15  }
   0x2   : > { %p184_p1 = scmp.lt.s32.totalorder %s615_s15, 3 }
   0x4   : > { %p185_p2 = pnand %p548_p0, %p184_p1 }
   0x5   : > { %p223_p3 = scmp.lt.s32.totalorder (!%p185_p2), %s544_s16, 1  ;;  %v290_v0 = vlaneseq (!%p185_p2)  ;;  %v621_v8 = vmov (!%p185_p2), 4294967295   ;;  %s678_s8 = smov (!%p185_p2), 0  }
   0x6   : > { %188 = sbr.rel (%p185_p2) target bundleno = 702 (0x2be), region = 32 }
   0x7   : > { %v291_v1 = vshrl.u32 (!%p185_p2), %v290_v0, 7  ;;  %v293_v2 = vand.u32 (!%p185_p2), 127, %v290_v0 }
   0x9   : > { %v303_v3 = vmul.u32 (!%p185_p2), 128, %v291_v1 }
   0xb   : > { %v304_v4 = vadd.s32 (!%p185_p2), %v303_v3, %v293_v2 }
   0xd   : > { %s729_s16 = smov (!%p223_p3, %s544_s16), 1  ;;  %v305_v7 = vcvt.s32.f32 %v304_v4 }
   0xe   : > { %s655_s17 = sshll.u32 %s729_s16, 5  ;;  %s553_s18 = sshll.u32 %s729_s16, 3 }
   0xf   : > { %s227_s21 = scalar_lea.vmem %s721_s0, %s655_s17  ;;  %s236_s24 = scalar_lea.vmem %s723_s2, %s553_s18  ;;  %307 = vst [vmem:[#allocation2 + $0x28] sm:$0xff] %v305_v7 }
  0x10   : > { %v561_v5 = vld [vmem:[%s227_s21 + $0x10] sm:$0xff]  ;;  %s667_s27 = scalar_lea.vmem %s725_s4, %s553_s18  ;;  %v562_v9 = vld [vmem:[%s227_s21 + $0x18] sm:$0xff]  ;;  %v308_v10 = vld [vmem:[%s236_s24] sm:$0xff]  ;;  %s232_s30 = scalar_lea.vmem %s722_s1, %s655_s17 }
  0x11   : > { %v264_v6 = vmul.f32 0.2, %v561_v5  ;;  %312 = vst [vmem:[%s667_s27] sm:$0xff] %v621_v8  ;;  %v270_v12 = vmul.f32 0.2, %v562_v9  ;;  %vm309_vm0 = vcmp.gt.f32.partialorder %v308_v10, 0.05  ;;  %s241_s7 = scalar_lea.vmem %s724_s3, %s655_s17 }
  0x12   : > { %v251_v13 = vld [vmem:[%s227_s21] sm:$0xff]  ;;  %v310_v15 = vsel %vm309_vm0, %v308_v10, -1e+30  ;;  %v560_v16 = vld [vmem:[%s227_s21 + $0x8] sm:$0xff]  ;;  %v557_v18 = vld [vmem:[%s232_s30 + $0x10] sm:$0xff] }
  0x13   : > { %v265_v11 = vmul.f32 1.442695, %v264_v6  ;;  %v271_v14 = vmul.f32 1.442695, %v270_v12  ;;  %311 = vst [vmem:[#allocation3] sm:$0xff] %v310_v15  ;;  %v558_v20 = vld [vmem:[%s232_s30 + $0x18] sm:$0xff] }
  0x14   : > { %v252_v17 = vmul.f32 0.1, %v251_v13  ;;  %v259_v19 = vmul.f32 0.1, %v560_v16  ;;  %v250_v22 = vld [vmem:[%s232_s30] sm:$0xff]  ;;  %v559_v25 = vld [vmem:[%s232_s30 + $0x8] sm:$0xff] }
  0x15   : > { %601 = vpow2.f32 %v265_v11 }
  0x16   : > { %603 = vpow2.f32 %v271_v14  ;;  %v253_v21 = vmul.f32 %v557_v18, %v252_v17  ;;  %v260_v23 = vmul.f32 %v558_v20, %v259_v19 }
  0x18   : > { %v254_v26 = vadd.f32 %v253_v21, %v250_v22  ;;  %v261_v30 = vadd.f32 %v559_v25, %v260_v23 }
  0x1f   : > { %v602_v24 = vpop.eup %601 }
  0x20   : > { %v267_v27 = vmul.f32 %v602_v24, %v557_v18  ;;  %v604_v28 = vpop.eup %603 }
  0x21   : > { %v273_v31 = vmul.f32 %v604_v28, %v558_v20 }
  0x22   : > { %v274_v29 = vmul.f32 0.5, %v267_v27 }
  0x23   : > { %v276_v33 = vmul.f32 0.5, %v273_v31 }
  0x24   : > { %v275_v32 = vsub.f32 %v254_v26, %v274_v29 }
  0x25   : > { %v277_v34 = vsub.f32 %v261_v30, %v276_v33 }
  0x26   : > { %283 = vst [vmem:[%s241_s7] sm:$0xff] %v275_v32  ;;  %294 = vst [vmem:[#allocation2] sm:$0xff] %v275_v32  ;;  %v278_v35 = vadd.f32 %v275_v32, %v267_v27 }
  0x27   : > { %563 = vst [vmem:[%s241_s7 + $0x8] sm:$0xff] %v277_v34  ;;  %296 = vst [vmem:[#allocation2 + $0x8] sm:$0xff] %v277_v34  ;;  %v279_v36 = vadd.f32 %v277_v34, %v273_v31 }
  0x28   : > { %564 = vst [vmem:[%s241_s7 + $0x10] sm:$0xff] %v278_v35  ;;  %298 = vst [vmem:[#allocation2 + $0x10] sm:$0xff] %v278_v35  ;;  %v280_v37 = vsub.f32 %v278_v35, %v275_v32 }
  0x29   : > { %565 = vst [vmem:[%s241_s7 + $0x18] sm:$0xff] %v279_v36  ;;  %300 = vst [vmem:[#allocation2 + $0x18] sm:$0xff] %v279_v36  ;;  %v281_v38 = vsub.f32 %v279_v36, %v277_v34 }
  0x2b   : > { %v282_v39 = vmul.f32 %v281_v38, %v280_v37 }
  0x2d   : > { %302 = vst [vmem:[#allocation2 + $0x20] sm:$0xff] %v282_v39 }
  0x2e LB: >> { %v683_v40 = vld [vmem:[#allocation3] sm:$0xff]  ;;  %s619_s8 = sphi %s678_s8, %s422_s8  }
  0x2f   : >> { %321 = vmax.xlane.f32.xlu0 %v683_v40 }
  0xbc   : >> { %v322_v41 = vpop.xlane.xlu0 %321 }
  0xbd   : >> { %v323_v42 = vrot.slane %v322_v41, 4 }
  0xbf   : >> { %v324_v43 = vmax.f32 %v322_v41, %v323_v42 }
  0xc1   : >> { %v325_v44 = vrot.slane %v324_v43, 2 }
  0xc3   : >> { %v326_v45 = vmax.f32 %v324_v43, %v325_v44 }
  0xc5   : >> { %v327_v46 = vrot.slane %v326_v45, 1 }
  0xc7   : >> { %v328_v47 = vmax.f32 %v326_v45, %v327_v46 }
  0xc9   : >> { %572 = vpush %v328_v47 }
  0xfa   : >> { %s686_s9 = spop %572 }
  0xfb   : >> { %p330_p4 = scmp.gt.f32.partialorder %s686_s9, 0.05 }
  0xfc   : >> { %v334_v48 = vld [vmem:[#allocation2 + $0x28] sm:$0xff] (%p330_p4)  ;;  %v335_v49 = vstv (%p330_p4), %s686_s9  ;;  %v397_v58 = vld [vmem:[%s667_s27] sm:$0xff] (%p330_p4)  ;;  %v398_v59 = vstv (%p330_p4), %s619_s8  ;;  %v351_v3 = vld [vmem:[#allocation2 + $0x10] sm:$0xff] (%p330_p4) }
  0xfd   : >> { %333 = sbr.rel (!%p330_p4) target bundleno = 690 (0x2b2), region = 43  ;;  %vm336_vm1 = vcmp.eq.f32.partialorder (%p330_p4), %v683_v40, %v335_v49  ;;  %v350_v60 = vld [vmem:[#allocation2 + $0x8] sm:$0xff] (%p330_p4)  ;;  %v349_v61 = vld [vmem:[#allocation2] sm:$0xff] (%p330_p4)  ;;  %v352_v4 = vld [vmem:[#allocation2 + $0x18] sm:$0xff] (%p330_p4) }
  0xfe   : >> { %v337_v50 = vsel (%p330_p4), %vm336_vm1, %v334_v48, 1024.0 }
  0xff   : >> { %338 = vmin.xlane.f32.xlu0 (%p330_p4), %v337_v50 }
 0x18c   : >> { %v339_v51 = vpop.xlane.xlu0 %338 }
 0x18d   : >> { %v340_v52 = vrot.slane %v339_v51, 4 }
 0x18f   : >> { %v341_v53 = vmin.f32 %v339_v51, %v340_v52 }
 0x191   : >> { %v342_v54 = vrot.slane %v341_v53, 2 }
 0x193   : >> { %v343_v55 = vmin.f32 %v341_v53, %v342_v54 }
 0x195   : >> { %v344_v56 = vrot.slane %v343_v55, 1 }
 0x197   : >> { %v345_v57 = vmin.f32 %v343_v55, %v344_v56 }
 0x199   : >> { %574 = vpush %v345_v57 }
 0x1ca   : >> { %s575_s10 = spop %574 }
 0x1cb   : >> { %v347_v62 = vstv %s575_s10 }
 0x1cc   : >> { %vm695_vm2 = vcmp.eq.f32.partialorder %v334_v48, %v347_v62  ;;  %v353_v48 = vld [vmem:[#allocation2 + $0x20] sm:$0xff] }
 0x1cd   : >> { %v399_v0 = vsel %vm695_vm2, %v398_v59, %v397_v58  ;;  %v364_v1 = vsel %vm695_vm2, %v350_v60, 0.0  ;;  %v354_v2 = vsel %vm695_vm2, %v349_v61, 0.0  ;;  %v374_v5 = vsel %vm695_vm2, %v351_v3, 0.0 }
 0x1ce   : >> { %400 = vst [vmem:[%s667_s27] sm:$0xff] %v399_v0  ;;  %365 = vadd.xlane.f32.xlu1 %v364_v1  ;;  %355 = vadd.xlane.f32.xlu0 %v354_v2  ;;  %v384_v6 = vsel %vm695_vm2, %v352_v4, 0.0 }
 0x1d2   : >> { %375 = vadd.xlane.f32.xlu1 %v374_v5  ;;  %385 = vadd.xlane.f32.xlu0 %v384_v6 }
 0x25b   : >> { %v366_v7 = vpop.xlane.xlu1 %365  ;;  %v356_v8 = vpop.xlane.xlu0 %355 }
 0x25c   : >> { %v367_v9 = vrot.slane %v366_v7, 4  ;;  %v357_v10 = vrot.slane %v356_v8, 4 }
 0x25e   : >> { %v368_v11 = vadd.f32 %v367_v9, %v366_v7  ;;  %v358_v12 = vadd.f32 %v357_v10, %v356_v8 }
 0x25f   : >> { %v376_v13 = vpop.xlane.xlu1 %375  ;;  %v386_v14 = vpop.xlane.xlu0 %385 }
 0x260   : >> { %v369_v15 = vrot.slane %v368_v11, 2  ;;  %v359_v16 = vrot.slane %v358_v12, 2  ;;  %v377_v17 = vrot.slane %v376_v13, 4  ;;  %v387_v18 = vrot.slane %v386_v14, 4 }
 0x262   : >> { %v378_v19 = vadd.f32 %v377_v17, %v376_v13  ;;  %v388_v20 = vadd.f32 %v387_v18, %v386_v14  ;;  %v360_v21 = vadd.f32 %v359_v16, %v358_v12  ;;  %v370_v22 = vadd.f32 %v369_v15, %v368_v11 }
 0x264   : >> { %v379_v23 = vrot.slane %v378_v19, 2  ;;  %v389_v24 = vrot.slane %v388_v20, 2  ;;  %v361_v25 = vrot.slane %v360_v21, 1  ;;  %v371_v26 = vrot.slane %v370_v22, 1 }
 0x266   : >> { %v380_v27 = vadd.f32 %v379_v23, %v378_v19  ;;  %v390_v28 = vadd.f32 %v389_v24, %v388_v20  ;;  %v362_v29 = vadd.f32 %v361_v25, %v360_v21  ;;  %v372_v30 = vadd.f32 %v371_v26, %v370_v22 }
 0x268   : >> { %576 = vpush %v362_v29  ;;  %v381_v31 = vrot.slane %v380_v27, 1  ;;  %v391_v32 = vrot.slane %v390_v28, 1 }
 0x269   : >> { %578 = vpush %v372_v30 }
 0x26a   : >> { %v382_v33 = vadd.f32 %v381_v31, %v380_v27  ;;  %v392_v34 = vadd.f32 %v391_v32, %v390_v28 }
 0x26c   : >> { %580 = vpush %v382_v33 }
 0x26d   : >> { %582 = vpush %v392_v34 }
 0x299   : >> { %s577_s11 = spop %576 }
 0x29a   : >> { %s579_s12 = spop %578  ;;  %v401_v35 = vstv %s577_s11 }
 0x29b   : >> { %v403_v36 = vstv %s579_s12  ;;  %v402_v38 = vmax.f32 %v349_v61, %v401_v35 }
 0x29c   : >> { %v404_v42 = vmax.f32 %v350_v60, %v403_v36 }
 0x29d   : >> { %s581_s13 = spop %580 }
 0x29e   : >> { %v405_v37 = vstv %s581_s13  ;;  %s583_s14 = spop %582  ;;  %s394_s16 = ssub.f32 %s581_s13, %s577_s11 }
 0x29f   : >> { %v406_v39 = vmin.f32 %v351_v3, %v405_v37  ;;  %v407_v41 = vstv %s583_s14  ;;  %s395_s17 = ssub.f32 %s583_s14, %s579_s12 }
 0x2a0   : >> { %v408_v43 = vmin.f32 %v352_v4, %v407_v41 }
 0x2a1   : >> { %v409_v44 = vsub.f32 %v406_v39, %v402_v38  ;;  %s396_s18 = smul.f32 %s395_s17, %s394_s16 }
 0x2a2   : >> { %v411_v45 = vsub.f32 %v408_v43, %v404_v42 }
 0x2a3   : >> { %v410_v46 = vmax.f32 %v409_v44, 0.0  ;;  %v415_v51 = vstv %s396_s18 }
 0x2a4   : >> { %v412_v47 = vmax.f32 %v411_v45, 0.0 }
 0x2a6   : >> { %v413_v49 = vmul.f32 %v412_v47, %v410_v46 }
 0x2a8   : >> { %v414_v50 = vsub.f32 %v353_v48, %v413_v49 }
 0x2aa   : >> { %v416_v52 = vadd.f32 %v415_v51, %v414_v50 }
 0x2ac   : >> { %v417_v53 = vmul.f32 0.3, %v416_v52 }
 0x2ae   : >> { %vm418_vm3 = vcmp.gt.f32.partialorder %v413_v49, %v417_v53 }
 0x2af   : >> { %vm419_vm4 = vmor %vm695_vm2, %vm418_vm3 }
 0x2b0   : >> { %v420_v54 = vsel %vm419_vm4, -1e+30, %v683_v40 }
 0x2b1   : >> { %421 = vst [vmem:[#allocation3] sm:$0xff] %v420_v54 }
 0x2b2 PF: >> { %s422_s8 = sadd.s32 1, %s619_s8  }
 0x2b3   : >> { %p423_p5 = scmp.lt.s32.totalorder %s422_s8, 1024 }
 0x2b5   : >> { %p424_p6 = pnand %p423_p5, %p330_p4 }
 0x2b7   : > { %319 = sbr.rel (!%p424_p6) target bundleno = 46 (0x2e), region = 105 }
 0x2be PF: > { %s15_s15 = sadd.s32 1, %s615_s15  }
 0x2bf   : > { %p12_p7 = scmp.ge.s32.totalorder %s15_s15, 4  }
 0x2c1   :  { %14 = sbr.rel (!%p12_p7) target bundleno = 1 (0x1), region = 116 }

</bundles_post_ra>
